<compile_context>
chip_gen: v5e
topology: v5e:2x2
jax: 0.10.0
libtpu: 0.0.40
codegen_flags: <defaults>
</compile_context>

<pallas_src>
import functools

import jax
import jax.numpy as jnp
from jax.experimental import pallas as pl
from jax.experimental.pallas import tpu as pltpu


# ---------------------------------------------------------------------------
# helpers
# ---------------------------------------------------------------------------

_VMEM_LIMIT = 32 * 1024 * 1024  # explicit scoped-VMEM cap (safe on v5e/v6e/v7x)


def _pick_tile(m, max_tile=256):
    """Largest multiple-of-8 token tile that divides m (capped), else m."""
    for t in (max_tile, 128, 64, 32, 16, 8):
        if t <= m and m % t == 0:
            return t
    return m


def _token_parallel_params():
    return pltpu.CompilerParams(
        dimension_semantics=("parallel",),
        vmem_limit_bytes=_VMEM_LIMIT,
    )


# ---------------------------------------------------------------------------
# Pallas kernels
# ---------------------------------------------------------------------------

def _layernorm_kernel(x_ref, g_ref, b_ref, o_ref, *, eps):
    x = x_ref[...].astype(jnp.float32)
    mu = jnp.mean(x, axis=-1, keepdims=True)
    xc = x - mu
    var = jnp.mean(xc * xc, axis=-1, keepdims=True)
    y = xc * jax.lax.rsqrt(var + eps)
    o_ref[...] = (y * g_ref[...] + b_ref[...]).astype(o_ref.dtype)


def layernorm(x, g, b, eps=1e-5):
    """Token-tiled LayerNorm over the hidden axis. x: (M, H)."""
    M, H = x.shape
    tm = _pick_tile(M)
    return pl.pallas_call(
        functools.partial(_layernorm_kernel, eps=eps),
        out_shape=jax.ShapeDtypeStruct((M, H), x.dtype),
        grid=(M // tm,),
        in_specs=[
            pl.BlockSpec((tm, H), lambda i: (i, 0)),
            pl.BlockSpec((1, H), lambda i: (0, 0)),
            pl.BlockSpec((1, H), lambda i: (0, 0)),
        ],
        out_specs=pl.BlockSpec((tm, H), lambda i: (i, 0)),
        compiler_params=_token_parallel_params(),
    )(x, g.reshape(1, H), b.reshape(1, H))


def _attn_block_kernel(x_ref, mask_ref, wqkv_ref, bqkv_ref, wo_ref, bo_ref,
                       g_ref, b_ref, o_ref, *, num_heads, eps):
    """Fused: QKV proj + MHA + output proj + residual + LayerNorm, one batch."""
    S, H = x_ref.shape
    dh = H // num_heads
    scale = 1.0 / float(dh) ** 0.5

    x = x_ref[...].astype(jnp.float32)                                   # (S, H)
    qkv = jnp.dot(x, wqkv_ref[...], preferred_element_type=jnp.float32)  # (S, 3H)
    qkv = qkv + bqkv_ref[...]
    q, k, v = qkv[:, :H], qkv[:, H:2 * H], qkv[:, 2 * H:]
    m = mask_ref[0]                                                      # (1, S) additive mask
    wo = wo_ref[...]                                                     # (H, H)

    # Accumulate out-projection per head:  ctx @ Wo == sum_h ctx_h @ Wo[h_rows, :]
    # (avoids materializing a concatenated context; residual + bias folded in).
    acc = x + bo_ref[...]                                                # (S, H)
    for h in range(num_heads):
        sl = slice(h * dh, (h + 1) * dh)
        s = jnp.dot(q[:, sl], k[:, sl].T,
                    preferred_element_type=jnp.float32) * scale + m      # (S, S)
        s = s - jnp.max(s, axis=-1, keepdims=True)
        p = jnp.exp(s)
        p = p * pl.reciprocal(jnp.sum(p, axis=-1, keepdims=True), approx=True)
        ctx_h = jnp.dot(p, v[:, sl], preferred_element_type=jnp.float32)  # (S, dh)
        acc = acc + jnp.dot(ctx_h, wo[sl, :],
                            preferred_element_type=jnp.float32)           # (S, H)

    mu = jnp.mean(acc, axis=-1, keepdims=True)
    yc = acc - mu
    var = jnp.mean(yc * yc, axis=-1, keepdims=True)
    yn = yc * jax.lax.rsqrt(var + eps)
    o_ref[...] = (yn * g_ref[...] + b_ref[...]).astype(o_ref.dtype)


def attention_block(x, add_mask, wqkv, bqkv, wo, bo, ln_g, ln_b,
                    *, num_heads, seq_len, eps=1e-5):
    """x: (B*S, H) token-major. add_mask: (B, 1, S) additive. Returns (B*S, H)."""
    M, H = x.shape
    B = M // seq_len
    return pl.pallas_call(
        functools.partial(_attn_block_kernel, num_heads=num_heads, eps=eps),
        out_shape=jax.ShapeDtypeStruct((M, H), x.dtype),
        grid=(B,),
        in_specs=[
            pl.BlockSpec((seq_len, H), lambda b: (b, 0)),       # this batch's tokens
            pl.BlockSpec((1, 1, seq_len), lambda b: (b, 0, 0)),  # its mask row
            pl.BlockSpec((H, 3 * H), lambda b: (0, 0)),          # resident weights
            pl.BlockSpec((1, 3 * H), lambda b: (0, 0)),
            pl.BlockSpec((H, H), lambda b: (0, 0)),
            pl.BlockSpec((1, H), lambda b: (0, 0)),
            pl.BlockSpec((1, H), lambda b: (0, 0)),
            pl.BlockSpec((1, H), lambda b: (0, 0)),
        ],
        out_specs=pl.BlockSpec((seq_len, H), lambda b: (b, 0)),
        compiler_params=pltpu.CompilerParams(
            dimension_semantics=("parallel",),
            vmem_limit_bytes=_VMEM_LIMIT,
        ),
    )(x, add_mask, wqkv, bqkv.reshape(1, 3 * H), wo, bo.reshape(1, H),
      ln_g.reshape(1, H), ln_b.reshape(1, H))


def _ffn_block_kernel(x_ref, wi_ref, bi_ref, wf_ref, bf_ref, g_ref, b_ref, o_ref,
                      *, eps):
    """Fused FFN: x@Wi + GELU + @Wf + residual + LayerNorm for one token tile."""
    x = x_ref[...].astype(jnp.float32)                                   # (TM, H)
    h = jnp.dot(x, wi_ref[...], preferred_element_type=jnp.float32) + bi_ref[...]
    # TODO(synk): HF RoBERTa uses exact (erf) GELU; tanh approximation used here.
    h = jax.nn.gelu(h, approximate=True)
    y = jnp.dot(h, wf_ref[...], preferred_element_type=jnp.float32) + bf_ref[...] + x
    mu = jnp.mean(y, axis=-1, keepdims=True)
    yc = y - mu
    var = jnp.mean(yc * yc, axis=-1, keepdims=True)
    yn = yc * jax.lax.rsqrt(var + eps)
    o_ref[...] = (yn * g_ref[...] + b_ref[...]).astype(o_ref.dtype)


def ffn_block(x, wi, bi, wf, bf, ln_g, ln_b, eps=1e-5):
    M, H = x.shape
    inter = wi.shape[1]
    tm = _pick_tile(M)
    return pl.pallas_call(
        functools.partial(_ffn_block_kernel, eps=eps),
        out_shape=jax.ShapeDtypeStruct((M, H), x.dtype),
        grid=(M // tm,),
        in_specs=[
            pl.BlockSpec((tm, H), lambda i: (i, 0)),
            pl.BlockSpec((H, inter), lambda i: (0, 0)),
            pl.BlockSpec((1, inter), lambda i: (0, 0)),
            pl.BlockSpec((inter, H), lambda i: (0, 0)),
            pl.BlockSpec((1, H), lambda i: (0, 0)),
            pl.BlockSpec((1, H), lambda i: (0, 0)),
            pl.BlockSpec((1, H), lambda i: (0, 0)),
        ],
        out_specs=pl.BlockSpec((tm, H), lambda i: (i, 0)),
        compiler_params=_token_parallel_params(),
    )(x, wi, bi.reshape(1, inter), wf, bf.reshape(1, H),
      ln_g.reshape(1, H), ln_b.reshape(1, H))


def _pooler_head_kernel(cls_ref, pw_ref, pb_ref, cw_ref, cb_ref, o_ref):
    """Fused tanh pooler + (concatenated) classifier heads."""
    cls = cls_ref[...].astype(jnp.float32)
    pooled = jnp.tanh(jnp.dot(cls, pw_ref[...],
                              preferred_element_type=jnp.float32) + pb_ref[...])
    # dropout0 is inference-mode identity.
    logits = jnp.dot(pooled, cw_ref[...],
                     preferred_element_type=jnp.float32) + cb_ref[...]
    o_ref[...] = logits.astype(o_ref.dtype)


def pooler_and_classify(cls, pool_w, pool_b, cls_w, cls_b):
    B, H = cls.shape
    N = cls_w.shape[1]
    return pl.pallas_call(
        _pooler_head_kernel,
        out_shape=jax.ShapeDtypeStruct((B, N), cls.dtype),
        grid=(1,),
        in_specs=[
            pl.BlockSpec((B, H), lambda i: (0, 0)),
            pl.BlockSpec((H, H), lambda i: (0, 0)),
            pl.BlockSpec((1, H), lambda i: (0, 0)),
            pl.BlockSpec((H, N), lambda i: (0, 0)),
            pl.BlockSpec((1, N), lambda i: (0, 0)),
        ],
        out_specs=pl.BlockSpec((B, N), lambda i: (0, 0)),
        compiler_params=pltpu.CompilerParams(vmem_limit_bytes=_VMEM_LIMIT),
    )(cls, pool_w, pool_b.reshape(1, H), cls_w, cls_b.reshape(1, N))


# ---------------------------------------------------------------------------
# Model: synthetic BERTweet encoder + mtt heads
# ---------------------------------------------------------------------------

def init_params(key, *, vocab=64, hidden=32, layers=2, heads=4, inter=64,
                max_pos=32, type_vocab=1):
    def dense(k, fan_in, fan_out):
        return jax.random.normal(k, (fan_in, fan_out), jnp.float32) * 0.02

    keys = jax.random.split(key, 8 + layers)
    params = {
        "num_heads": heads,
        "word_emb": jax.random.normal(keys[0], (vocab, hidden), jnp.float32) * 0.02,
        "pos_emb": jax.random.normal(keys[1], (max_pos, hidden), jnp.float32) * 0.02,
        "type_emb": jax.random.normal(keys[2], (type_vocab, hidden), jnp.float32) * 0.02,
        "emb_ln_g": jnp.ones((hidden,), jnp.float32),
        "emb_ln_b": jnp.zeros((hidden,), jnp.float32),
        "pool_w": dense(keys[3], hidden, hidden),
        "pool_b": jnp.zeros((hidden,), jnp.float32),
        "cls0_w": dense(keys[4], hidden, 4),     # classifier0: hidden -> 4 (stance)
        "cls0_b": jnp.zeros((4,), jnp.float32),
        "cls1_w": dense(keys[5], hidden, 2),     # classifier1: hidden -> 2 (viral)
        "cls1_b": jnp.zeros((2,), jnp.float32),
        "layers": [],
    }
    for l in range(layers):
        lk = jax.random.split(keys[8 + l], 6)
        wq = dense(lk[0], hidden, hidden)
        wk = dense(lk[1], hidden, hidden)
        wv = dense(lk[2], hidden, hidden)
        params["layers"].append({
            # Pre-fused QKV weight/bias (single MXU matmul per attention block).
            "wqkv": jnp.concatenate([wq, wk, wv], axis=1),
            "bqkv": jnp.zeros((3 * hidden,), jnp.float32),
            "wo": dense(lk[3], hidden, hidden), "bo": jnp.zeros((hidden,), jnp.float32),
            "ln1_g": jnp.ones((hidden,), jnp.float32), "ln1_b": jnp.zeros((hidden,), jnp.float32),
            "wi": dense(lk[4], hidden, inter), "bi": jnp.zeros((inter,), jnp.float32),
            "wf": dense(lk[5], inter, hidden), "bf": jnp.zeros((hidden,), jnp.float32),
            "ln2_g": jnp.ones((hidden,), jnp.float32), "ln2_b": jnp.zeros((hidden,), jnp.float32),
        })
    return params


def bertweet_encoder(params, input_ids, attention_mask):
    """Returns (last_hidden_state (B,S,H), cls_hidden (B,H))."""
    B, S = input_ids.shape
    H = params["word_emb"].shape[1]
    nH = params["num_heads"]

    # Embeddings (gathers are glue in plain JAX) + LayerNorm (Pallas).
    # TODO(synk): RoBERTa offsets position ids by padding_idx+1; arange used here.
    pos_ids = jnp.arange(S)
    tok_type = jnp.zeros((B, S), jnp.int32)
    emb = (params["word_emb"][input_ids]
           + params["pos_emb"][pos_ids][None, :, :]
           + params["type_emb"][tok_type])
    x = layernorm(emb.reshape(B * S, H), params["emb_ln_g"], params["emb_ln_b"])

    # Additive attention mask: 0 where attended, -1e9 where padded.
    add_mask = ((1.0 - attention_mask.astype(jnp.float32)) * -1e9).reshape(B, 1, S)

    for layer in params["layers"]:
        # Fused attention block: QKV proj + MHA + out proj + residual + LN.
        x = attention_block(x, add_mask, layer["wqkv"], layer["bqkv"],
                            layer["wo"], layer["bo"], layer["ln1_g"], layer["ln1_b"],
                            num_heads=nH, seq_len=S)
        # Fused FFN block: Wi + GELU + Wf + residual + LN (intermediate in VMEM).
        x = ffn_block(x, layer["wi"], layer["bi"], layer["wf"], layer["bf"],
                      layer["ln2_g"], layer["ln2_b"])

    hidden = x.reshape(B, S, H)
    cls = hidden[:, 0, :]                                   # CLS token
    return hidden, cls


def mtt_bertweet_forward(params, input_ids, attention_mask=None, task="stance"):
    """Mirrors mtt_Bertweet.forward: returns (stance_logits, viral_logits)."""
    if attention_mask is None:
        attention_mask = jnp.ones_like(input_ids)
    if task not in ["stance", "multi", "viral"]:
        raise Exception("Task not found: " + task)

    _, cls = bertweet_encoder(params, input_ids, attention_mask)

    # Single fused pooler+classifier launch; classifier weights concatenated
    # according to the task gate.
    if task == "stance":
        cw, cb = params["cls0_w"], params["cls0_b"]
    elif task == "viral":
        cw, cb = params["cls1_w"], params["cls1_b"]
    else:  # multi
        cw = jnp.concatenate([params["cls0_w"], params["cls1_w"]], axis=1)
        cb = jnp.concatenate([params["cls0_b"], params["cls1_b"]], axis=0)

    logits = pooler_and_classify(cls, params["pool_w"], params["pool_b"], cw, cb)

    stance_logits = None
    viral_logits = None
    if task == "stance":
        stance_logits = logits
    elif task == "viral":
        viral_logits = logits
    else:
        stance_logits = logits[:, :4]
        viral_logits = logits[:, 4:]
    return (stance_logits, viral_logits)


# ---------------------------------------------------------------------------
# Main
# ---------------------------------------------------------------------------

if __name__ == "__main__":
    B, S = 2, 8
    VOCAB = 64

    key = jax.random.PRNGKey(0)
    pkey, ikey = jax.random.split(key)
    params = init_params(pkey, vocab=VOCAB, hidden=32, layers=2, heads=4, inter=64)

    input_ids = jax.random.randint(ikey, (B, S), 0, VOCAB, dtype=jnp.int32)
    attention_mask = jnp.ones((B, S), jnp.int32).at[1, S - 2:].set(0)  # pad tail of batch 1

    stance_logits, viral_logits = mtt_bertweet_forward(
        params, input_ids, attention_mask=attention_mask, task="multi")

    jax.block_until_ready(stance_logits)
    jax.block_until_ready(viral_logits)
    assert stance_logits.shape == (B, 4)
    assert viral_logits.shape == (B, 2)
    assert bool(jnp.all(jnp.isfinite(stance_logits)))
    assert bool(jnp.all(jnp.isfinite(viral_logits)))
    print("KERNEL_OK")
</pallas_src>

<mosaic_0001>
module attributes {stable_mosaic.version = 11 : i64} {
  func.func @_layernorm_kernel(%arg0: i32, %arg1: memref<16x32xf32, #tpu.memory_space<vmem>>, %arg2: memref<1x32xf32, #tpu.memory_space<vmem>>, %arg3: memref<1x32xf32, #tpu.memory_space<vmem>>, %arg4: memref<16x32xf32, #tpu.memory_space<vmem>>) attributes {dimension_semantics = [#tpu.dimension_semantics<parallel>], iteration_bounds = array<i64: 1>, scalar_prefetch = 0 : i64, scratch_operands = 0 : i64, tpu.core_type = #tpu.core_type<tc>, window_params = [{transform_indices = @transform_0, window_bounds = array<i64: 16, 32>}, {pipeline_mode = #tpu.pipeline_mode<synchronous>, transform_indices = @transform_1, window_bounds = array<i64: 1, 32>}, {pipeline_mode = #tpu.pipeline_mode<synchronous>, transform_indices = @transform_2, window_bounds = array<i64: 1, 32>}, {transform_indices = @transform_3, window_bounds = array<i64: 16, 32>}]} {
    %c0 = arith.constant 0 : index
    %c0_0 = arith.constant 0 : index
    %0 = vector.load %arg1[%c0, %c0_0] : memref<16x32xf32, #tpu.memory_space<vmem>>, vector<16x32xf32>
    %cst = arith.constant dense<0.000000e+00> : vector<16xf32>
    %1 = vector.multi_reduction <add>, %0, %cst [1] : vector<16x32xf32> to vector<16xf32>
    %2 = vector.shape_cast %1 : vector<16xf32> to vector<16x1xf32>
    %cst_1 = arith.constant 3.200000e+01 : f32
    %3 = vector.broadcast %cst_1 : f32 to vector<16x1xf32>
    %4 = arith.divf %2, %3 : vector<16x1xf32>
    %5 = vector.broadcast %4 : vector<16x1xf32> to vector<16x32xf32>
    %6 = arith.subf %0, %5 : vector<16x32xf32>
    %7 = arith.mulf %6, %6 : vector<16x32xf32>
    %cst_2 = arith.constant dense<0.000000e+00> : vector<16xf32>
    %8 = vector.multi_reduction <add>, %7, %cst_2 [1] : vector<16x32xf32> to vector<16xf32>
    %9 = vector.shape_cast %8 : vector<16xf32> to vector<16x1xf32>
    %cst_3 = arith.constant 3.200000e+01 : f32
    %10 = vector.broadcast %cst_3 : f32 to vector<16x1xf32>
    %11 = arith.divf %9, %10 : vector<16x1xf32>
    %cst_4 = arith.constant 9.99999974E-6 : f32
    %12 = vector.broadcast %cst_4 : f32 to vector<16x1xf32>
    %13 = arith.addf %11, %12 : vector<16x1xf32>
    %14 = math.rsqrt %13 : vector<16x1xf32>
    %15 = vector.broadcast %14 : vector<16x1xf32> to vector<16x32xf32>
    %16 = arith.mulf %6, %15 : vector<16x32xf32>
    %c0_5 = arith.constant 0 : index
    %c0_6 = arith.constant 0 : index
    %17 = vector.load %arg2[%c0_5, %c0_6] : memref<1x32xf32, #tpu.memory_space<vmem>>, vector<1x32xf32>
    %18 = vector.broadcast %17 : vector<1x32xf32> to vector<16x32xf32>
    %19 = arith.mulf %16, %18 : vector<16x32xf32>
    %c0_7 = arith.constant 0 : index
    %c0_8 = arith.constant 0 : index
    %20 = vector.load %arg3[%c0_7, %c0_8] : memref<1x32xf32, #tpu.memory_space<vmem>>, vector<1x32xf32>
    %21 = vector.broadcast %20 : vector<1x32xf32> to vector<16x32xf32>
    %22 = arith.addf %19, %21 : vector<16x32xf32>
    %c0_9 = arith.constant 0 : index
    %c0_10 = arith.constant 0 : index
    %23 = vector.load %arg4[%c0_9, %c0_10] : memref<16x32xf32, #tpu.memory_space<vmem>>, vector<16x32xf32>
    tpu.vector_store %arg4[%c0_9, %c0_10], %22 {strides = array<i32>} : memref<16x32xf32, #tpu.memory_space<vmem>>, vector<16x32xf32>,
    return
  }
  func.func @transform_0(%arg0: i32) -> (i32, i32) {
    %c0_i32 = arith.constant 0 : i32
    %c0_i32_0 = arith.constant 0 : i32
    return %arg0, %c0_i32 : i32, i32
  }
  func.func @transform_1(%arg0: i32) -> (i32, i32) {
    %c0_i32 = arith.constant 0 : i32
    %c0_i32_0 = arith.constant 0 : i32
    %c0_i32_1 = arith.constant 0 : i32
    return %c0_i32, %c0_i32_0 : i32, i32
  }
  func.func @transform_2(%arg0: i32) -> (i32, i32) {
    %c0_i32 = arith.constant 0 : i32
    %c0_i32_0 = arith.constant 0 : i32
    %c0_i32_1 = arith.constant 0 : i32
    return %c0_i32, %c0_i32_0 : i32, i32
  }
  func.func @transform_3(%arg0: i32) -> (i32, i32) {
    %c0_i32 = arith.constant 0 : i32
    %c0_i32_0 = arith.constant 0 : i32
    return %arg0, %c0_i32 : i32, i32
  }
}

</mosaic_0001>

<bundles_post_ra>
// kernel: tpu_custom_call.1
= control target key start
LH: loop header
LB: loop body
LE: loop exit
PB: predicated region body
PF: predicated region fallthrough
CT: control target
= control target key end

     0   :  { %8 = vsyncpa [#allocation3], 0  ;;  %s275_s0 = inlined_call_operand.hbm [shape: f32[16,32], index: 0, kind: input, shape index: {}]   ;;  %s276_s1 = inlined_call_operand.hbm [shape: f32[1,32], index: 1, kind: input, shape index: {}]   ;;  %s277_s2 = inlined_call_operand.vmem [shape: f32[1,32], index: 2, kind: input, shape index: {}]   ;;  %s278_s3 = inlined_call_operand.hbm [shape: f32[16,32], index: 3, kind: output, shape index: {}]  }
   0x1   :  { %9 = vsyncpa [#allocation6], 0 }
   0x2   :  { %10 = vsyncpa [#allocation4], 0  ;;  %s15_s14 = sshll.u32 %s275_s0, 4  ;;  %s225_s15 = smov [#allocation2]   ;;  %s16_s14 = int_to_ptr.hbm [resolvable:$true] %s15_s14 }
   0x3   :  { %s17_s16 = sshll.u32 %s225_s15, 4  ;;  %s29_s19 = sshll.u32 %s276_s1, 4  ;;  %s18_s16 = int_to_ptr.vmem [resolvable:$true] %s17_s16  ;;  %s30_s19 = int_to_ptr.hbm [resolvable:$true] %s29_s19 }
   0x4   :  { %s226_s20 = smov 128   ;;  %s227_s21 = smov 8  }
   0x5   :  { %23 = dma.hbm_to_vmem [thread:$0]  %s16_s14, 256, %s18_s16, [#allocation3], %s226_s20, %s226_s20, %s227_s21  }
   0x6   :  { %s228_s22 = smov [#allocation5]  }
   0x7   :  { %s31_s23 = sshll.u32 %s228_s22, 4  ;;  %s32_s23 = int_to_ptr.vmem [resolvable:$true] %s31_s23 }
   0x8   :  { %34 = dma.hbm_to_vmem [thread:$0]  %s30_s19, 16, %s32_s23, [#allocation6]  }
   0x9   :  { %219 = dma.done.wait [#allocation3], 256  }
   0xa   :  { %220 = vsyncadd [#allocation3], 4294967040 }
   0xb   :  { %221 = dma.done.wait [#allocation6], 16  }
   0xc   :  { %222 = vsyncadd [#allocation6], 4294967280  ;;  %vm47_vm0 = vcmask 261120   ;;  %v45_v0 = vld [vmem:[#allocation2] sm:$0xff]  ;;  %v46_v2 = vld [vmem:[#allocation2 + $0x8] sm:$0xff]  ;;  %v229_v4 = vmov 32.0  }
   0xd   :  { %v48_v1 = vsel %vm47_vm0, %v45_v0, 0.0  ;;  %v51_v3 = vsel %vm47_vm0, %v46_v2, 0.0  ;;  %141 = vrcp.f32 %v229_v4  ;;  %v139_v35 = vld [vmem:[#allocation5] ss:$0 sm:$0xff]  ;;  %v140_v39 = vld [vmem:[%s277_s2] ss:$0 sm:$0xff] }
   0xe   :  { %49 = vadd.xlane.f32.xlu0 %v48_v1  ;;  %s230_s24 = smov [#allocation7]   ;;  %s119_s28 = sshll.u32 %s278_s3, 4  ;;  %s120_s28 = int_to_ptr.hbm [resolvable:$true] %s119_s28 }
   0xf   :  { %s117_s25 = sshll.u32 %s230_s24, 4  ;;  %s118_s25 = int_to_ptr.vmem [resolvable:$true] %s117_s25 }
  0x13   :  { %v142_v5 = vpop.eup %141 }
  0x14   :  { %v55_v6 = vmul.f32 32.0, %v142_v5  ;;  %vm59_vm1 = vweird.f32 %v142_v5 }
  0x16   :  { %52 = vadd.xlane.f32.xlu0 %v51_v3  ;;  %v56_v7 = vsub.f32 1.0, %v55_v6 }
  0x18   :  { %v57_v8 = vmul.f32 %v142_v5, %v56_v7 }
  0x1a   :  { %v58_v9 = vadd.f32 %v142_v5, %v57_v8 }
  0x1c   :  { %v60_v10 = vsel %vm59_vm1, %v142_v5, %v58_v9 }
  0x81   :  { %v50_v11 = vpop.xlane.xlu0 %49 }
  0x82   :  { %v61_v12 = vmul.f32 %v60_v10, %v50_v11 }
  0x84   :  { %v63_v13 = vsub.f32 %v45_v0, %v61_v12 }
  0x86   :  { %v65_v14 = vmul.f32 %v63_v13, %v63_v13 }
  0x88   :  { %v67_v15 = vsel %vm47_vm0, %v65_v14, 0.0 }
  0x89   :  { %68 = vadd.xlane.f32.xlu1 %v67_v15  ;;  %v53_v16 = vpop.xlane.xlu0 %52 }
  0x8a   :  { %v62_v17 = vmul.f32 %v60_v10, %v53_v16 }
  0x8c   :  { %v64_v18 = vsub.f32 %v46_v2, %v62_v17 }
  0x8e   :  { %v66_v19 = vmul.f32 %v64_v18, %v64_v18 }
  0x90   :  { %v70_v20 = vsel %vm47_vm0, %v66_v19, 0.0 }
  0x91   :  { %71 = vadd.xlane.f32.xlu1 %v70_v20 }
  0xfc   :  { %v69_v21 = vpop.xlane.xlu1 %68 }
  0xfd   :  { %v73_v22 = vmul.f32 %v69_v21, %v60_v10 }
  0xff   :  { %v75_v23 = vadd.f32 1e-05, %v73_v22 }
 0x101   :  { %143 = vrsqrt.f32 %v75_v23  ;;  %vm83_vm3 = vweird.f32 %v75_v23 }
 0x104   :  { %v72_v24 = vpop.xlane.xlu1 %71 }
 0x105   :  { %v74_v25 = vmul.f32 %v72_v24, %v60_v10 }
 0x107   :  { %v144_v26 = vpop.eup %143  ;;  %v76_v27 = vadd.f32 1e-05, %v74_v25 }
 0x108   :  { %v78_v28 = vmul.f32 %v144_v26, %v75_v23  ;;  %vm84_vm2 = vweird.f32 %v144_v26 }
 0x109   :  { %145 = vrsqrt.f32 %v76_v27  ;;  %vm85_vm4 = vmor %vm83_vm3, %vm84_vm2  ;;  %vm93_vm6 = vweird.f32 %v76_v27 }
 0x10a   :  { %v79_v29 = vmul.f32 %v144_v26, %v78_v28 }
 0x10c   :  { %v80_v30 = vmul.f32 0.5, %v79_v29 }
 0x10e   :  { %v81_v31 = vsub.f32 1.5, %v80_v30 }
 0x10f   :  { %v146_v32 = vpop.eup %145 }
 0x110   :  { %v82_v33 = vmul.f32 %v144_v26, %v81_v31  ;;  %v88_v34 = vmul.f32 %v146_v32, %v76_v27  ;;  %vm94_vm5 = vweird.f32 %v146_v32 }
 0x111   :  { %vm95_vm7 = vmor %vm93_vm6, %vm94_vm5 }
 0x112   :  { %v86_v36 = vsel %vm85_vm4, %v144_v26, %v82_v33  ;;  %v89_v37 = vmul.f32 %v146_v32, %v88_v34 }
 0x113   :  { %v97_v38 = vmul.f32 %v86_v36, %v63_v13 }
 0x114   :  { %v90_v40 = vmul.f32 0.5, %v89_v37 }
 0x115   :  { %v103_v41 = vmul.f32 %v139_v35, %v97_v38 }
 0x116   :  { %v91_v42 = vsub.f32 1.5, %v90_v40 }
 0x117   :  { %v109_v43 = vadd.f32 %v140_v39, %v103_v41 }
 0x118   :  { %v92_v44 = vmul.f32 %v146_v32, %v91_v42 }
 0x119   :  { %111 = vst.msk [vmem:[#allocation7] sm:$0xff] %vm47_vm0, %v109_v43 }
 0x11a   :  { %v96_v45 = vsel %vm95_vm7, %v146_v32, %v92_v44 }
 0x11b   :  { %v98_v46 = vmul.f32 %v96_v45, %v64_v18 }
 0x11d   :  { %v104_v47 = vmul.f32 %v139_v35, %v98_v46 }
 0x11f   :  { %v110_v48 = vadd.f32 %v140_v39, %v104_v47 }
 0x121   :  { %112 = vst.msk [vmem:[#allocation7 + $0x8] sm:$0xff] %vm47_vm0, %v110_v48 }
 0x122   :  { %125 = dma.vmem_to_hbm [thread:$0]  %s118_s25, 256, %s120_s28, [#allocation4], %s226_s20, %s226_s20, %s227_s21  }
 0x123   :  { %223 = dma.done.wait [#allocation4], 256  }
 0x124   :  { %224 = vsyncadd [#allocation4], 4294967040 }
 0x125   :  { %130 = vsyncpa [#allocation3], 1 }
 0x126   :  { %131 = vsyncpa [#allocation6], 1 }
 0x127   :  { %132 = vsyncpa [#allocation4], 1 }

</bundles_post_ra>
